<compile_context>
chip_gen: v7x
topology: tpu7x:2x2x1
jax: 0.10.0
libtpu: 0.0.40
codegen_flags: <defaults>
</compile_context>

<pallas_src>
import jax
import jax.numpy as jnp
import numpy as np
from jax.experimental import pallas as pl
from jax.experimental.pallas import tpu as pltpu


def _rotary_kernel(inv_freq_ref, cos_ref, sin_ref):
    # inv_freq_ref: (1, dim)  -- already cat(inv_freq, inv_freq), VMEM-resident
    # cos_ref/sin_ref: (TS, dim) output tile for this grid step
    ts, dim = cos_ref.shape
    # absolute position index t for each row of this tile
    row = jax.lax.broadcasted_iota(jnp.int32, (ts, dim), 0) + pl.program_id(0) * ts
    t = row.astype(jnp.float32)
    freqs = t * inv_freq_ref[...]          # broadcast (1, dim) over rows -> emb
    cos_ref[...] = jnp.cos(freqs).astype(cos_ref.dtype)
    sin_ref[...] = jnp.sin(freqs).astype(sin_ref.dtype)


def make_inv_freq(dim, base=10000.0):
    """Matches Rotary.__init__: 1 / base**(arange(0, dim, 2)/dim)."""
    return 1.0 / (base ** (jnp.arange(0, dim, 2, dtype=jnp.float32) / dim))


def rotary(x, inv_freq, seq_dim=1):
    """Returns (cos, sin), each of shape (1, seq_len, 1, dim), dtype float32.

    x is only used for its shape along seq_dim (as in the PyTorch module).
    """
    seq_len = x.shape[seq_dim]
    half = inv_freq.shape[0]
    dim = 2 * half

    # emb = cat(freqs, freqs, -1)  <=>  pre-tile inv_freq once in the wrapper.
    inv_freq_full = jnp.concatenate([inv_freq, inv_freq])[None, :].astype(jnp.float32)

    # Seq-dim tiling: single block for short sequences; 2048-row (multiple of 8)
    # lane-dense tiles otherwise. Partial trailing blocks are handled by Pallas.
    max_ts = 2048
    ts = seq_len if seq_len <= max_ts else max_ts
    grid = (pl.cdiv(seq_len, ts),)

    cos, sin = pl.pallas_call(
        _rotary_kernel,
        out_shape=(
            jax.ShapeDtypeStruct((seq_len, dim), jnp.float32),
            jax.ShapeDtypeStruct((seq_len, dim), jnp.float32),
        ),
        grid=grid,
        in_specs=[
            # constant index_map -> the (1, dim) row stays resident in VMEM
            pl.BlockSpec((1, dim), lambda i: (0, 0)),
        ],
        out_specs=(
            pl.BlockSpec((ts, dim), lambda i: (i, 0)),
            pl.BlockSpec((ts, dim), lambda i: (i, 0)),
        ),
        compiler_params=pltpu.CompilerParams(
            dimension_semantics=("parallel",),
        ),
    )(inv_freq_full)

    # Match torch's cos_cached/sin_cached shape: (1, S, 1, dim)
    return cos[None, :, None, :], sin[None, :, None, :]


# TODO(synk): the PyTorch module caches cos/sin per seq_len as module state;
# in JAX this statefulness has no direct equivalent — under jit the table is
# effectively cached by shape specialization instead.


if __name__ == "__main__":
    # Small shapes implied by the forward: x ~ (B, S, H, D), seq_dim=1, dim=D.
    B, S, H, D = 2, 8, 4, 32
    base = 10000.0

    key = jax.random.PRNGKey(0)
    x = jax.random.normal(key, (B, S, H, D), jnp.float32)

    inv_freq = make_inv_freq(D, base)
    cos, sin = rotary(x, inv_freq, seq_dim=1)
    cos = jax.block_until_ready(cos)
    sin = jax.block_until_ready(sin)

    # Pure-JAX reference (mirrors the PyTorch forward exactly).
    t = jnp.arange(S, dtype=jnp.float32)
    freqs = jnp.einsum("i,j->ij", t, inv_freq)
    emb = jnp.concatenate([freqs, freqs], axis=-1)
    ref_cos = jnp.cos(emb)[None, :, None, :]
    ref_sin = jnp.sin(emb)[None, :, None, :]

    assert cos.shape == (1, S, 1, D) and sin.shape == (1, S, 1, D)
    np.testing.assert_allclose(np.asarray(cos), np.asarray(ref_cos), rtol=1e-5, atol=1e-5)
    np.testing.assert_allclose(np.asarray(sin), np.asarray(ref_sin), rtol=1e-5, atol=1e-5)

    # Exercise a second sequence length (the module recomputes on seq_len change).
    S2 = 16
    x2 = jax.random.normal(jax.random.PRNGKey(1), (B, S2, H, D), jnp.float32)
    cos2, sin2 = rotary(x2, inv_freq, seq_dim=1)
    cos2 = jax.block_until_ready(cos2)
    sin2 = jax.block_until_ready(sin2)
    t2 = jnp.arange(S2, dtype=jnp.float32)
    emb2 = jnp.concatenate([jnp.einsum("i,j->ij", t2, inv_freq)] * 2, axis=-1)
    np.testing.assert_allclose(np.asarray(cos2), np.asarray(jnp.cos(emb2))[None, :, None, :],
                               rtol=1e-5, atol=1e-5)
    np.testing.assert_allclose(np.asarray(sin2), np.asarray(jnp.sin(emb2))[None, :, None, :],
                               rtol=1e-5, atol=1e-5)

    print("KERNEL_OK")
</pallas_src>

<mosaic_0001>
module attributes {stable_mosaic.version = 11 : i64} {
  func.func @_rotary_kernel(%arg0: i32, %arg1: memref<1x32xf32, #tpu.memory_space<vmem>>, %arg2: memref<8x32xf32, #tpu.memory_space<vmem>>, %arg3: memref<8x32xf32, #tpu.memory_space<vmem>>) attributes {dimension_semantics = [#tpu.dimension_semantics<parallel>], iteration_bounds = array<i64: 1>, scalar_prefetch = 0 : i64, scratch_operands = 0 : i64, tpu.core_type = #tpu.core_type<tc>, window_params = [{pipeline_mode = #tpu.pipeline_mode<synchronous>, transform_indices = @transform_0, window_bounds = array<i64: 1, 32>}, {transform_indices = @transform_1, window_bounds = array<i64: 8, 32>}, {transform_indices = @transform_2, window_bounds = array<i64: 8, 32>}]} {
    %0 = tpu.iota {dimensions = array<i32: 0>} : vector<8x32xi32>
    %c8_i32 = arith.constant 8 : i32
    %1 = arith.muli %arg0, %c8_i32 : i32
    %2 = vector.broadcast %1 : i32 to vector<8x32xi32>
    %3 = arith.addi %0, %2 : vector<8x32xi32>
    %4 = arith.sitofp %3 : vector<8x32xi32> to vector<8x32xf32>
    %c0 = arith.constant 0 : index
    %c0_0 = arith.constant 0 : index
    %5 = vector.load %arg1[%c0, %c0_0] : memref<1x32xf32, #tpu.memory_space<vmem>>, vector<1x32xf32>
    %6 = vector.broadcast %5 : vector<1x32xf32> to vector<8x32xf32>
    %7 = arith.mulf %4, %6 : vector<8x32xf32>
    %8 = math.cos %7 : vector<8x32xf32>
    %c0_1 = arith.constant 0 : index
    %c0_2 = arith.constant 0 : index
    %9 = vector.load %arg2[%c0_1, %c0_2] : memref<8x32xf32, #tpu.memory_space<vmem>>, vector<8x32xf32>
    tpu.vector_store %arg2[%c0_1, %c0_2], %8 {strides = array<i32>} : memref<8x32xf32, #tpu.memory_space<vmem>>, vector<8x32xf32>,
    %10 = math.sin %7 : vector<8x32xf32>
    %c0_3 = arith.constant 0 : index
    %c0_4 = arith.constant 0 : index
    %11 = vector.load %arg3[%c0_3, %c0_4] : memref<8x32xf32, #tpu.memory_space<vmem>>, vector<8x32xf32>
    tpu.vector_store %arg3[%c0_3, %c0_4], %10 {strides = array<i32>} : memref<8x32xf32, #tpu.memory_space<vmem>>, vector<8x32xf32>,
    return
  }
  func.func @transform_0(%arg0: i32) -> (i32, i32) {
    %c0_i32 = arith.constant 0 : i32
    %c0_i32_0 = arith.constant 0 : i32
    %c0_i32_1 = arith.constant 0 : i32
    return %c0_i32, %c0_i32_0 : i32, i32
  }
  func.func @transform_1(%arg0: i32) -> (i32, i32) {
    %c0_i32 = arith.constant 0 : i32
    %c0_i32_0 = arith.constant 0 : i32
    return %arg0, %c0_i32 : i32, i32
  }
  func.func @transform_2(%arg0: i32) -> (i32, i32) {
    %c0_i32 = arith.constant 0 : i32
    %c0_i32_0 = arith.constant 0 : i32
    return %arg0, %c0_i32 : i32, i32
  }
}

</mosaic_0001>

<bundles_post_ra>
// kernel: tpu_custom_call.1
= control target key start
LH: loop header
LB: loop body
LE: loop exit
PB: predicated region body
PF: predicated region fallthrough
CT: control target
= control target key end

     0   :  { %8 = vsyncpa [#allocation3], 0  ;;  %s456_s0 = inlined_call_operand.hbm [shape: f32[1,32], index: 0, kind: input, shape index: {}]   ;;  %s457_s1 = inlined_call_operand.hbm [shape: f32[8,32], index: 1, kind: output, shape index: {0}]   ;;  %s458_s2 = inlined_call_operand.hbm [shape: f32[8,32], index: 2, kind: output, shape index: {1}]  }
   0x1   :  { %9 = vsyncpa [#allocation4], 0 }
   0x2   :  { %10 = vsyncpa [#allocation7], 0  ;;  %s375_s9 = smov [#allocation2]   ;;  %s303_s13 = scalar_lea.hbm %s456_s0, 16 }
   0x3   :  { %s17_s10 = sshll.u32 %s375_s9, 4  ;;  %p304_p0 = scmp.ne.s32.totalorder %s456_s0, %s303_s13  ;;  %s18_s10 = int_to_ptr.vmem [resolvable:$true] %s17_s10 }
   0x4   :  { %p307_p1 = scmp.lt.u32.totalorder %s303_s13, %s456_s0 }
   0x6   :  { %p309_p2 = pnand %p307_p1, %p304_p0 }
   0x8   :  { %312 = shalt.err (!%p309_p2)
}
   0x9   :  { %s313_s18 = scalar_lea.vmem %s18_s10, 16  ;;  %s317_s19 = scalar_lea.vmem %s18_s10, 32 }
   0xa   :  { %p314_p3 = scmp.ne.s32.totalorder %s18_s10, %s313_s18  ;;  %p318_p4 = scmp.lt.s32.totalorder %s18_s10, %s18_s10 }
   0xb   :  { %p319_p5 = scmp.lt.s32.totalorder %s317_s19, %s313_s18 }
   0xd   :  { %p320_p6 = por %p319_p5, %p318_p4 }
   0xf   :  { %p321_p7 = pnand %p320_p6, %p314_p3 }
  0x11   :  { %324 = shalt.err (!%p321_p7)
}
  0x12   :  { %20 = dma.hbm_to_vmem [thread:$0]  %s456_s0, 16, %s18_s10, [#allocation3]  }
  0x13   :  { %369 = dma.done.wait [#allocation3], 16  }
  0x14   :  { %370 = vsyncadd [#allocation3], 4294967280  ;;  %v24_v0 = vlaneseq  ;;  %v277_v3 = vld [vmem:[#allocation2] ss:$0 sm:$0xff]  ;;  %v376_v16 = vmov 683565275  }
  0x15   :  { %v377_v18 = vmov 2475754826   ;;  %v378_v20 = vmov 2131351028   ;;  %v379_v22 = vmov 2102212464  }
  0x16   :  { %v25_v1 = vshrl.u32 %v24_v0, 7  ;;  %v380_v24 = vmov 920167782   ;;  %v381_v31 = vmov 1326507024   ;;  %s382_s0 = smov [#allocation5]  }
  0x17   :  { %s254_s22 = sshll.u32 %s382_s0, 4  ;;  %s383_s23 = smov [#allocation6]   ;;  %s255_s22 = int_to_ptr.vmem [resolvable:$true] %s254_s22 }
  0x18   :  { %v29_v2 = vcvt.s32.f32 %v25_v1  ;;  %s264_s24 = sshll.u32 %s383_s23, 4  ;;  %s325_s25 = scalar_lea.vmem %s255_s22, 128  ;;  %s265_s24 = int_to_ptr.vmem [resolvable:$true] %s264_s24 }
  0x19   :  { %p326_p8 = scmp.ne.s32.totalorder %s255_s22, %s325_s25  ;;  %p330_p9 = scmp.lt.s32.totalorder %s255_s22, %s255_s22 }
  0x1a   :  { %v411_v4 = vmul.f32 %v277_v3, %v29_v2  ;;  %p331_p10 = scmp.lt.s32.totalorder %s325_s25, %s325_s25 }
  0x1c   :  { %v41_v5 = vand.u32 2139095040, %v411_v4  ;;  %v38_v7 = vand.u32 2147483647, %v411_v4  ;;  %vm40_vm7 = vcmp.lt.s32.totalorder %v411_v4, 0  ;;  %vm130_vm15 = vweird.f32 %v411_v4  ;;  %p332_p11 = por %p331_p10, %p330_p9 }
  0x1e   :  { %v42_v6 = vshrl.u32 %v41_v5, 23  ;;  %v45_v10 = vand.u32 8388607, %v38_v7  ;;  %vm39_vm8 = vcmp.le.f32.partialorder %v38_v7, 0.7853982  ;;  %p333_p12 = pnand %p332_p11, %p326_p8 }
  0x20   :  { %v278_v8 = vadd.s32 4294967169, %v42_v6  ;;  %v46_v13 = vor.u32 8388608, %v45_v10 }
  0x22   :  { %v48_v9 = vadd.s32 1, %v278_v8  ;;  %v86_v33 = vshll.u32 %v46_v13, 8 }
  0x24   :  { %vm49_vm0 = vcmp.gt.s32.totalorder %v48_v9, 0 }
  0x25   :  { %v50_v11 = vsel %vm49_vm0, %v48_v9, 0  ;;  %vm141_vm0 = vcmask 261120  }
  0x26   :  { %v52_v12 = vand.u32 31, %v50_v11  ;;  %v51_v14 = vshrl.u32 %v50_v11, 5 }
  0x28   :  { %v53_v15 = vsub.s32 32, %v52_v12  ;;  %v55_v17 = vshll.u32 %v376_v16, %v52_v12  ;;  %v58_v19 = vshll.u32 %v377_v18, %v52_v12  ;;  %v61_v21 = vshll.u32 %v378_v20, %v52_v12 }
  0x29   :  { %v64_v23 = vshll.u32 %v379_v22, %v52_v12  ;;  %v67_v25 = vshll.u32 %v380_v24, %v52_v12  ;;  %vm70_vm1 = vcmp.lt.s32.totalorder %v51_v14, 1  ;;  %vm73_vm2 = vcmp.lt.s32.totalorder %v51_v14, 4 }
  0x2a   :  { %v54_v26 = vshrl.u32 %v376_v16, %v53_v15  ;;  %v56_v27 = vshrl.u32 %v377_v18, %v53_v15  ;;  %v59_v28 = vshrl.u32 %v378_v20, %v53_v15  ;;  %v62_v29 = vshrl.u32 %v379_v22, %v53_v15 }
  0x2b   :  { %v65_v30 = vshrl.u32 %v380_v24, %v53_v15  ;;  %v68_v32 = vshrl.u32 %v381_v31, %v53_v15  ;;  %vm71_vm3 = vcmp.lt.s32.totalorder %v51_v14, 2  ;;  %vm72_vm4 = vcmp.lt.s32.totalorder %v51_v14, 3 }
  0x2c   :  { %v57_v34 = vor.u32 %v56_v27, %v55_v17  ;;  %v60_v35 = vor.u32 %v59_v28, %v58_v19  ;;  %v63_v36 = vor.u32 %v62_v29, %v61_v21 }
  0x2d   :  { %v66_v37 = vor.u32 %v65_v30, %v64_v23  ;;  %v69_v38 = vor.u32 %v68_v32, %v67_v25 }
  0x2e   :  { %v74_v39 = vsel %vm70_vm1, %v54_v26, %v57_v34  ;;  %v75_v40 = vsel %vm73_vm2, %v63_v36, 2102212464  ;;  %v78_v41 = vsel %vm70_vm1, %v57_v34, %v60_v35  ;;  %v82_v42 = vsel %vm70_vm1, %v60_v35, %v63_v36 }
  0x2f   :  { %v76_v43 = vsel %vm72_vm4, %v60_v35, %v75_v40  ;;  %v79_v44 = vsel %vm73_vm2, %v66_v37, 920167782  ;;  %v83_v45 = vsel %vm73_vm2, %v69_v38, 1326507024 }
  0x30   :  { %v80_v46 = vsel %vm72_vm4, %v63_v36, %v79_v44  ;;  %v84_v47 = vsel %vm72_vm4, %v66_v37, %v83_v45  ;;  %v77_v48 = vsel %vm71_vm3, %v74_v39, %v76_v43 }
  0x31   :  { %v81_v49 = vsel %vm71_vm3, %v78_v41, %v80_v46  ;;  %v85_v50 = vsel %vm71_vm3, %v82_v42, %v84_v47  ;;  %v93_v55 = vmul.u32 %v86_v33, %v77_v48 }
  0x32   :  { %v417_v51 = vmul.u32.u64.low %v86_v33, %v85_v50  ;;  %v418_v52 = vmul.u32.u64.high %v86_v33, %v85_v50, %v417_v51  ;;  %v420_v53 = vmul.u32.u64.low %v86_v33, %v81_v49  ;;  %v421_v54 = vmul.u32.u64.high %v86_v33, %v81_v49, %v420_v53 }
  0x34   :  { %vm95_vm5 = vc.u32 %v418_v52, %v420_v53  ;;  %v96_v56 = vadd.s32 1, %v421_v54  ;;  %v94_v3 = vadd.s32 %v420_v53, %v418_v52 }
  0x36   :  { %v97_v57 = vsel %vm95_vm5, %v96_v56, %v421_v54 }
  0x37   :  { %v98_v58 = vadd.s32 %v97_v57, %v93_v55 }
  0x39   :  { %v99_v59 = vadd.s32 536870912, %v98_v58 }
  0x3b   :  { %v100_v60 = vshrl.u32 %v99_v59, 30 }
  0x3d   :  { %v101_v61 = vshll.u32 %v100_v60, 30  ;;  %v124_v17 = vsub.s32 4, %v100_v60 }
  0x3f   :  { %v102_v62 = vsub.s32 %v98_v58, %v101_v61  ;;  %v125_v20 = vsel %vm40_vm7, %v124_v17, %v100_v60 }
  0x40   :  { %v127_v23 = vsel %vm39_vm8, 0, %v125_v20 }
  0x41   :  { %v104_v63 = vsub.s32 0, %v102_v62  ;;  %v236_v24 = vadd.s32 3, %v127_v23  ;;  %v131_v25 = vand.u32 3, %v127_v23 }
  0x43   :  { %v279_v0 = vmin.u32 %v104_v63, %v102_v62  ;;  %v237_v26 = vand.u32 3, %v236_v24  ;;  %vm136_vm9 = vcmp.eq.s32.totalorder %v131_v25, 2  ;;  %vm133_vm11 = vcmp.eq.s32.totalorder %v131_v25, 0 }
  0x44   :  { %vm132_vm13 = vcmp.lt.s32.totalorder %v131_v25, 2 }
  0x45   :  { %v106_v1 = vclz %v279_v0  ;;  %vm242_vm10 = vcmp.eq.s32.totalorder %v237_v26, 2  ;;  %vm239_vm12 = vcmp.eq.s32.totalorder %v237_v26, 0  ;;  %vm238_vm14 = vcmp.lt.s32.totalorder %v237_v26, 2 }
  0x47   :  { %v280_v2 = vadd.s32 4294967294, %v106_v1 }
  0x49   :  { %vm281_vm6 = vcmp.lt.s32.totalorder %v280_v2, 0 }
  0x4a   :  { %v109_v5 = vsel %vm281_vm6, 0, %v280_v2 }
  0x4b   :  { %v110_v6 = vsub.s32 32, %v109_v5  ;;  %v111_v8 = vshll.u32 %v102_v62, %v109_v5  ;;  %v114_v9 = vsub.s32 4294967266, %v109_v5 }
  0x4d   :  { %v112_v10 = vshrl.u32 %v94_v3, %v110_v6  ;;  %v115_v11 = vadd.s32 127, %v114_v9 }
  0x4f   :  { %v113_v12 = vor.u32 %v112_v10, %v111_v8  ;;  %v116_v13 = vshll.u32 %v115_v11, 23 }
  0x51   :  { %v117_v14 = vor.u32 4788187, %v116_v13  ;;  %v120_v15 = vcvt.s32.f32 %v113_v12 }
  0x53   :  { %v118_v16 = vand.u32 2147483647, %v117_v14 }
  0x55   :  { %v121_v18 = vmul.f32 %v120_v15, %v118_v16 }
  0x57   :  { %v122_v19 = vxor.u32 2147483648, %v121_v18 }
  0x59   :  { %v123_v21 = vsel %vm40_vm7, %v122_v19, %v121_v18 }
  0x5a   :  { %v126_v22 = vsel %vm39_vm8, %v411_v4, %v123_v21 }
  0x5b   :  { %299 = vcosq.f32 %v126_v22 }
  0x5c   :  { %301 = vsinq.f32 %v126_v22 }
  0x65   :  { %v300_v27 = vpop.eup %299 }
  0x66   :  { %v302_v28 = vpop.eup %301  ;;  %v137_v29 = vxor.u32 2147483648, %v300_v27 }
  0x67   :  { %v134_v7 = vxor.u32 2147483648, %v302_v28 }
  0x68   :  { %v138_v30 = vsel %vm136_vm9, %v137_v29, %v302_v28  ;;  %v244_v31 = vsel %vm242_vm10, %v137_v29, %v302_v28 }
  0x69   :  { %v135_v32 = vsel %vm133_vm11, %v300_v27, %v134_v7  ;;  %v241_v33 = vsel %vm239_vm12, %v300_v27, %v134_v7 }
  0x6a   :  { %v139_v34 = vsel %vm132_vm13, %v135_v32, %v138_v30  ;;  %v245_v35 = vsel %vm238_vm14, %v241_v33, %v244_v31 }
  0x6b   :  { %v140_v36 = vsel %vm130_vm15, nan, %v139_v34  ;;  %v246_v37 = vsel %vm130_vm15, nan, %v245_v35 }
  0x6c   :  { %142 = vst.msk [vmem:[#allocation5] sm:$0xff] %vm141_vm0, %v140_v36  ;;  %247 = vst.msk [vmem:[#allocation6] sm:$0xff] %vm141_vm0, %v246_v37 }
  0x6d   :  { %336 = shalt.err (!%p333_p12)
}
  0x6e   :  { %s337_s28 = scalar_lea.hbm %s457_s1, 128 }
  0x6f   :  { %p338_p13 = scmp.ne.s32.totalorder %s457_s1, %s337_s28  ;;  %p341_p0 = scmp.lt.u32.totalorder %s337_s28, %s457_s1 }
  0x71   :  { %p343_p1 = pnand %p341_p0, %p338_p13 }
  0x73   :  { %346 = shalt.err (!%p343_p1)
}
  0x74   :  { %257 = dma.vmem_to_hbm [thread:$0]  %s255_s22, 128, %s457_s1, [#allocation4]  }
  0x75   :  { %s347_s7 = scalar_lea.vmem %s265_s24, 128  ;;  %p352_p3 = scmp.lt.s32.totalorder %s265_s24, %s265_s24 }
  0x76   :  { %p348_p2 = scmp.ne.s32.totalorder %s265_s24, %s347_s7  ;;  %p353_p4 = scmp.lt.s32.totalorder %s347_s7, %s347_s7 }
  0x78   :  { %p354_p5 = por %p353_p4, %p352_p3 }
  0x7a   :  { %p355_p6 = pnand %p354_p5, %p348_p2 }
  0x7c   :  { %358 = shalt.err (!%p355_p6)
}
  0x7d   :  { %s359_s10 = scalar_lea.hbm %s458_s2, 128 }
  0x7e   :  { %p360_p7 = scmp.ne.s32.totalorder %s458_s2, %s359_s10  ;;  %p363_p8 = scmp.lt.u32.totalorder %s359_s10, %s458_s2 }
  0x80   :  { %p365_p9 = pnand %p363_p8, %p360_p7 }
  0x82   :  { %368 = shalt.err (!%p365_p9)
}
  0x83   :  { %267 = dma.vmem_to_hbm [thread:$0]  %s265_s24, 128, %s458_s2, [#allocation7]  }
  0x84   :  { %371 = dma.done.wait [#allocation4], 128  }
  0x85   :  { %372 = vsyncadd [#allocation4], 4294967168 }
  0x86   :  { %373 = dma.done.wait [#allocation7], 128  }
  0x87   :  { %374 = vsyncadd [#allocation7], 4294967168 }
  0x88   :  { %274 = vsyncpa [#allocation3], 1 }
  0x89   :  { %275 = vsyncpa [#allocation4], 1 }
  0x8a   :  { %276 = vsyncpa [#allocation7], 1 }

</bundles_post_ra>
